<compile_context>
chip_gen: v5e
topology: v5e:2x2
jax: 0.10.0
libtpu: 0.0.40
codegen_flags: <defaults>
</compile_context>

<pallas_src>
import functools

import numpy as np
import jax
import jax.numpy as jnp
from jax import lax
from jax.experimental import pallas as pl
from jax.experimental.pallas import tpu as pltpu


# ---------------------------------------------------------------------------
# Stage 1: projection  proj = emb @ W   (bf16 on the MXU, f32 accumulate)
# ---------------------------------------------------------------------------
def _proj_kernel(emb_ref, w_ref, out_ref):
    out_ref[...] = jnp.dot(
        emb_ref[...], w_ref[...], preferred_element_type=jnp.float32
    ).astype(out_ref.dtype)


def _project(emb_bf, w_bf):
    M, D = emb_bf.shape
    H = w_bf.shape[1]
    tm = M if M <= 512 else 512
    return pl.pallas_call(
        _proj_kernel,
        out_shape=jax.ShapeDtypeStruct((M, H), jnp.bfloat16),
        grid=(pl.cdiv(M, tm),),
        in_specs=[pl.BlockSpec((tm, D), lambda m: (m, 0)),
                  pl.BlockSpec((D, H), lambda m: (0, 0))],
        out_specs=pl.BlockSpec((tm, H), lambda m: (m, 0)),
        compiler_params=pltpu.CompilerParams(
            dimension_semantics=("parallel",),
            vmem_limit_bytes=32 * 1024 * 1024),
    )(emb_bf, w_bf)


# ---------------------------------------------------------------------------
# Stage 2: tiled structured loss over grid (batch, i-tile, j-tile)
# ---------------------------------------------------------------------------
def _structured_loss_kernel(lens_ref,                  # SMEM (B,) int32 (scalar prefetch)
                            proj_i_ref,                # (1, T, H) bf16  — rows
                            projT_j_ref,               # (1, H, T) bf16  — cols (pre-T)
                            u_ref,                     # (1, 1, T) f32   — unpaired score
                            ap_ref,                    # (1, 1, T) f32   — any_pair per row
                            pairs_ref,                 # (1, T, T) int8  — reference mask
                            out_ref,                   # (1, 1, 1) f32   — per (b,i) partial
                            acc_ref,                   # VMEM (1, T) f32 — lane-shaped acc
                            *, loss_pos_paired, loss_neg_paired,
                            loss_pos_unpaired, loss_neg_unpaired):
    b = pl.program_id(0)
    i = pl.program_id(1)
    j = pl.program_id(2)
    n_j = pl.num_programs(2)

    ti = proj_i_ref.shape[1]
    tj = pairs_ref.shape[2]
    i0 = i * ti
    j0 = j * tj
    length = lens_ref[b]

    @pl.when(j == 0)
    def _init():
        acc_ref[...] = jnp.zeros_like(acc_ref)

    # ---- unpaired hinge terms: once per (b, i) row-tile, at the first j step ----
    @pl.when(jnp.logical_and(j == 0, i0 < length))
    def _unpaired():
        u_row = u_ref[0]                                   # (1, ti) f32, lane-dense
        paired = ap_ref[0] > 0.5                           # (1, ti) bool
        pos = i0 + lax.broadcasted_iota(jnp.int32, (1, ti), 1)
        vpos = pos < length
        aug_u = u_row + jnp.where(paired, loss_neg_unpaired, -loss_pos_unpaired)
        contrib_u = jnp.where(
            vpos, jnp.maximum(aug_u, 0.0) - jnp.where(paired, 0.0, u_row), 0.0)
        acc_ref[...] += contrib_u

    # ---- paired hinge terms: only tiles intersecting {row < col < length} -------
    do_pairs = jnp.logical_and(
        jnp.logical_and(i0 < length, j0 < length), j0 + (tj - 1) > i0)

    @pl.when(do_pairs)
    def _pairwise():
        # Natural MXU shape: [ti, H] x [H, tj] -> [ti, tj], f32 accumulate.
        s = jnp.dot(proj_i_ref[0], projT_j_ref[0],
                    preferred_element_type=jnp.float32)
        row_i = i0 + lax.broadcasted_iota(jnp.int32, (ti, 1), 0)   # (ti, 1)
        col_j = j0 + lax.broadcasted_iota(jnp.int32, (1, tj), 1)   # (1, tj)
        in_len = col_j < length                                    # (1, tj)
        valid = jnp.logical_and(row_i < col_j, in_len)             # (ti, tj)
        pb = jnp.logical_and(pairs_ref[0] > 0, in_len)             # (ti, tj) bool
        # TODO(synk): real mxfold2 runs a Zuker-style constrained DP for both the
        # loss-augmented argmax and the reference score; replaced here by
        # independent per-pair hinge terms (a relaxation of StructuredLoss).
        aug = s + jnp.where(pb, -loss_pos_paired, loss_neg_paired)
        contrib = jnp.where(
            valid, jnp.maximum(aug, 0.0) - jnp.where(pb, s, 0.0), 0.0)
        # sublane reduce into a lane-shaped accumulator (no per-tile scalar reduce)
        acc_ref[...] += jnp.sum(contrib, axis=0, keepdims=True)

    @pl.when(j == n_j - 1)
    def _finalize():
        out_ref[...] = jnp.sum(acc_ref[...]).reshape(1, 1, 1)


def structured_loss(fm_embedding, pairs, lengths, W, wu, *,
                    loss_pos_paired=0.0, loss_neg_paired=0.0,
                    loss_pos_unpaired=0.0, loss_neg_unpaired=0.0,
                    l1_weight=0.0):
    B, L, D = fm_embedding.shape
    H = W.shape[1]
    f32 = jnp.float32

    # ---- stage 1: projection, bf16-in / f32-accumulate on the MXU --------------
    emb_bf = fm_embedding.astype(jnp.bfloat16).reshape(B * L, D)
    w_bf = W.astype(jnp.bfloat16)
    proj = _project(emb_bf, w_bf).reshape(B, L, H)          # (B, L, H) bf16
    projT = jnp.swapaxes(proj, 1, 2)                        # (B, H, L) bf16 (one XLA transpose)

    # unpaired score folded algebraically:  u = emb @ (W @ wu^T)   (exact f32)
    wu_fold = jnp.dot(W, wu.reshape(H), preferred_element_type=f32)      # (D,)
    u = jnp.einsum('bld,d->bl', fm_embedding, wu_fold,
                   preferred_element_type=f32).reshape(B, 1, L)          # lane-dense

    lens_i32 = lengths.astype(jnp.int32)

    # reference pair mask shipped as int8 (4x less HBM traffic than f32)
    pairs_i8 = pairs if pairs.dtype == jnp.int8 else (pairs != 0).astype(jnp.int8)

    # any_pair per row (length-masked) precomputed once in plain JAX (tiny (B, L))
    col_in_len = (jnp.arange(L, dtype=jnp.int32)[None, None, :]
                  < lens_i32[:, None, None])
    any_pair = jnp.any(jnp.logical_and(pairs_i8 != 0, col_in_len),
                       axis=2).astype(f32).reshape(B, 1, L)

    # Tile size: 512 amortizes the ~0.35 us/step pipeline overhead and keeps the
    # pairs double-buffer + f32 epilogue intermediates ~11 MiB (safe on v7x 64 MiB).
    T = L if L <= 512 else 512
    n_i = pl.cdiv(L, T)
    n_j = pl.cdiv(L, T)

    kernel = functools.partial(
        _structured_loss_kernel,
        loss_pos_paired=float(loss_pos_paired),
        loss_neg_paired=float(loss_neg_paired),
        loss_pos_unpaired=float(loss_pos_unpaired),
        loss_neg_unpaired=float(loss_neg_unpaired),
    )

    grid_spec = pltpu.PrefetchScalarGridSpec(
        num_scalar_prefetch=1,
        grid=(B, n_i, n_j),
        in_specs=[
            pl.BlockSpec((1, T, H), lambda b, i, j, lens: (b, i, 0)),    # proj rows
            pl.BlockSpec((1, H, T), lambda b, i, j, lens: (b, 0, j)),    # projT cols
            pl.BlockSpec((1, 1, T), lambda b, i, j, lens: (b, 0, i)),    # unpaired u
            pl.BlockSpec((1, 1, T), lambda b, i, j, lens: (b, 0, i)),    # any_pair
            pl.BlockSpec((1, T, T), lambda b, i, j, lens: (b, i, j)),    # pairs tile
        ],
        # per-(b, i) partials so both b and i can be megacore-parallel on v7x
        out_specs=pl.BlockSpec((1, 1, 1),
                               lambda b, i, j, lens: (b * n_i + i, 0, 0)),
        scratch_shapes=[pltpu.VMEM((1, T), jnp.float32)],    # lane-shaped accumulator
    )

    vmem_bytes = (
        2 * 2 * (T * H * 2)     # proj_i + projT_j tiles, double-buffered bf16
        + 2 * 2 * (T * 4)       # u + any_pair tiles, double-buffered f32
        + 2 * (T * T * 1)       # pairs tile, double-buffered int8
        + 10 * (T * T * 4)      # headroom for f32 epilogue intermediates
        + (T * 4)               # accumulator scratch
    )
    vmem_limit = int(min(max(vmem_bytes, 32 * 1024 * 1024), 48 * 1024 * 1024))

    partials = pl.pallas_call(
        kernel,
        out_shape=jax.ShapeDtypeStruct((B * n_i, 1, 1), jnp.float32),
        grid_spec=grid_spec,
        compiler_params=pltpu.CompilerParams(
            # b and i are independent (per-(b,i) outputs) -> parallel for megacore;
            # j accumulates into scratch -> must stay "arbitrary".
            dimension_semantics=("parallel", "parallel", "arbitrary"),
            vmem_limit_bytes=vmem_limit),
    )(lens_i32, proj, projT, u, any_pair, pairs_i8)

    denom = jnp.maximum(lens_i32, 1).astype(f32)             # guard length == 0
    loss = partials.reshape(B, n_i).sum(axis=1) / denom

    if l1_weight > 0.0:
        # L1 regulariser over the (tiny) model params in plain JAX — avoids a
        # separate kernel launch and an HBM round-trip of a padded copy.
        loss = loss + l1_weight * (jnp.sum(jnp.abs(W)) + jnp.sum(jnp.abs(wu)))

    return loss


if __name__ == "__main__":
    B, L, D, H = 2, 16, 32, 32
    key = jax.random.PRNGKey(0)
    k_emb, k_w, k_wu = jax.random.split(key, 3)

    fm_embedding = jax.random.normal(k_emb, (B, L, D), jnp.float32)
    W = 0.1 * jax.random.normal(k_w, (D, H), jnp.float32)     # synthetic model params
    wu = 0.1 * jax.random.normal(k_wu, (1, H), jnp.float32)
    lengths = jnp.array([16, 12], jnp.int32)

    # deterministic reference structures: a few outer hairpin pairs per sequence
    pairs_np = np.zeros((B, L, L), dtype=np.int8)
    for b, n in enumerate([16, 12]):
        for i in range(3):
            pairs_np[b, i, n - 1 - i] = 1
            pairs_np[b, n - 1 - i, i] = 1
    pairs = jnp.asarray(pairs_np)

    loss = structured_loss(
        fm_embedding, pairs, lengths, W, wu,
        loss_pos_paired=0.5, loss_neg_paired=0.005,
        loss_pos_unpaired=0.0, loss_neg_unpaired=0.0,
        l1_weight=0.001,
    )
    jax.block_until_ready(loss)
    print("KERNEL_OK")
</pallas_src>

<mosaic_0001>
module attributes {stable_mosaic.version = 11 : i64} {
  func.func @_proj_kernel(%arg0: i32, %arg1: memref<32x32xbf16, #tpu.memory_space<vmem>>, %arg2: memref<32x32xbf16, #tpu.memory_space<vmem>>, %arg3: memref<32x32xbf16, #tpu.memory_space<vmem>>) attributes {dimension_semantics = [#tpu.dimension_semantics<parallel>], iteration_bounds = array<i64: 1>, scalar_prefetch = 0 : i64, scratch_operands = 0 : i64, tpu.core_type = #tpu.core_type<tc>, window_params = [{transform_indices = @transform_0, window_bounds = array<i64: 32, 32>}, {pipeline_mode = #tpu.pipeline_mode<synchronous>, transform_indices = @transform_1, window_bounds = array<i64: 32, 32>}, {transform_indices = @transform_2, window_bounds = array<i64: 32, 32>}]} {
    %c0 = arith.constant 0 : index
    %c0_0 = arith.constant 0 : index
    %0 = vector.load %arg1[%c0, %c0_0] : memref<32x32xbf16, #tpu.memory_space<vmem>>, vector<32x32xbf16>
    %c0_1 = arith.constant 0 : index
    %c0_2 = arith.constant 0 : index
    %1 = vector.load %arg2[%c0_1, %c0_2] : memref<32x32xbf16, #tpu.memory_space<vmem>>, vector<32x32xbf16>
    %cst = arith.constant dense<0.000000e+00> : vector<32x32xf32>
    %2 = tpu.matmul %0, %1, %cst {dimension_numbers = #tpu.dot_dimension_numbers<[1], [0], [0], [1], [0, 0, 1, 1], [], []>} : vector<32x32xbf16>, vector<32x32xbf16>, vector<32x32xf32> -> vector<32x32xf32>
    %3 = arith.truncf %2 : vector<32x32xf32> to vector<32x32xbf16>
    %c0_3 = arith.constant 0 : index
    %c0_4 = arith.constant 0 : index
    %4 = vector.load %arg3[%c0_3, %c0_4] : memref<32x32xbf16, #tpu.memory_space<vmem>>, vector<32x32xbf16>
    tpu.vector_store %arg3[%c0_3, %c0_4], %3 {strides = array<i32>} : memref<32x32xbf16, #tpu.memory_space<vmem>>, vector<32x32xbf16>,
    return
  }
  func.func @transform_0(%arg0: i32) -> (i32, i32) {
    %c0_i32 = arith.constant 0 : i32
    %c0_i32_0 = arith.constant 0 : i32
    return %arg0, %c0_i32 : i32, i32
  }
  func.func @transform_1(%arg0: i32) -> (i32, i32) {
    %c0_i32 = arith.constant 0 : i32
    %c0_i32_0 = arith.constant 0 : i32
    %c0_i32_1 = arith.constant 0 : i32
    return %c0_i32, %c0_i32_0 : i32, i32
  }
  func.func @transform_2(%arg0: i32) -> (i32, i32) {
    %c0_i32 = arith.constant 0 : i32
    %c0_i32_0 = arith.constant 0 : i32
    return %arg0, %c0_i32 : i32, i32
  }
}

</mosaic_0001>

<bundles_post_ra>
// kernel: tpu_custom_call.1
= control target key start
LH: loop header
LB: loop body
LE: loop exit
PB: predicated region body
PF: predicated region fallthrough
CT: control target
= control target key end

     0   :  { %7 = vsyncpa [#allocation3], 0  ;;  %s279_s0 = inlined_call_operand.hbm [shape: bf16[32,32], index: 0, kind: input, shape index: {}]   ;;  %s280_s1 = inlined_call_operand.hbm [shape: bf16[32,32], index: 1, kind: input, shape index: {}]   ;;  %s281_s2 = inlined_call_operand.hbm [shape: bf16[32,32], index: 2, kind: output, shape index: {}]  }
   0x1   :  { %8 = vsyncpa [#allocation6], 0 }
   0x2   :  { %9 = vsyncpa [#allocation4], 0  ;;  %s14_s11 = sshll.u32 %s279_s0, 4  ;;  %s237_s12 = smov [#allocation2]   ;;  %s15_s11 = int_to_ptr.hbm [resolvable:$true] %s14_s11 }
   0x3   :  { %s16_s13 = sshll.u32 %s237_s12, 4  ;;  %s27_s16 = sshll.u32 %s280_s1, 4  ;;  %s17_s13 = int_to_ptr.vmem [resolvable:$true] %s16_s13  ;;  %s28_s16 = int_to_ptr.hbm [resolvable:$true] %s27_s16 }
   0x4   :  { %s238_s17 = smov 64   ;;  %s239_s18 = smov 4  }
   0x5   :  { %22 = dma.hbm_to_vmem [thread:$0]  %s15_s11, 256, %s17_s13, [#allocation3], %s238_s17, %s238_s17, %s239_s18  }
   0x6   :  { %s240_s19 = smov [#allocation5]  }
   0x7   :  { %s29_s20 = sshll.u32 %s240_s19, 4  ;;  %s30_s20 = int_to_ptr.vmem [resolvable:$true] %s29_s20 }
   0x8   :  { %35 = dma.hbm_to_vmem [thread:$0]  %s28_s16, 256, %s30_s20, [#allocation6], %s238_s17, %s238_s17, %s239_s18  }
   0x9   :  { %231 = dma.done.wait [#allocation3], 256  }
   0xa   :  { %232 = vsyncadd [#allocation3], 4294967040 }
   0xb   :  { %233 = dma.done.wait [#allocation6], 256  }
   0xc   :  { %234 = vsyncadd [#allocation6], 4294967040  ;;  %v151_v0 = vld [vmem:[#allocation5 + $0x8] sm:$0xff]  ;;  %v150_v1 = vld [vmem:[#allocation5] sm:$0xff]  ;;  %vm75_vm0 = vcmask 261120   ;;  %vm105_vm1 = vcmask 257024  }
   0xd   :  { %88 = vmatpush.bf16.msra.mxu0 %v151_v0  ;;  %152 = vmatpush.bf16.msra.mxu1 %v151_v0  ;;  %v148_v2 = vld [vmem:[#allocation2] sm:$0xff]  ;;  %v149_v3 = vld [vmem:[#allocation2 + $0x8] sm:$0xff]  ;;  %s241_s0 = smov [#allocation7]   ;;  %s116_s23 = sshll.u32 %s281_s2, 4  ;;  %s117_s23 = int_to_ptr.hbm [resolvable:$true] %s116_s23 }
   0xe   :  { %s114_s1 = sshll.u32 %s241_s0, 4  ;;  %s115_s1 = int_to_ptr.vmem [resolvable:$true] %s114_s1 }
  0x11   :  { %89 = vmatpush.bf16.msra.mxu0 %v150_v1  ;;  %153 = vmatpush.bf16.msra.mxu1 %v150_v1 }
  0x14   :  { %146 = vmatmul.msk.bf16.vlgmr.msra.gmra.mxu0 %vm75_vm0, %v148_v2  ;;  %147 = vmatmul.msk.bf16.vlgmr.msra.gmra.mxu1 %vm75_vm0, %v149_v3 }
  0x91   :  { %v91_v4 = vpop.f32.mrf.mxu0  ;;  %v96_v5 = vpop.f32.mrf.mxu1 }
  0x92   :  { %v101_v6 = vpack.c.bf16 %v91_v4, %v91_v4  ;;  %v103_v7 = vpack.c.bf16 %v96_v5, %v96_v5 }
  0x94   :  { %106 = vst.msk [vmem:[#allocation7] sm:$0xf] %vm105_vm1, %v101_v6 }
  0x95   :  { %108 = vst.msk [vmem:[#allocation7 + $0x8] sm:$0xf] %vm105_vm1, %v103_v7 }
  0x99   :  { %v93_v8 = vpop.f32.mrf.mxu0  ;;  %v98_v9 = vpop.f32.mrf.mxu1 }
  0x9a   :  { %v102_v10 = vpack.c.bf16 %v93_v8, %v93_v8  ;;  %v104_v11 = vpack.c.bf16 %v98_v9, %v98_v9 }
  0x9c   :  { %107 = vst.msk [vmem:[#allocation7 + $0x4] sm:$0xf] %vm105_vm1, %v102_v10 }
  0x9d   :  { %109 = vst.msk [vmem:[#allocation7 + $0xc] sm:$0xf] %vm105_vm1, %v104_v11 }
  0x9e   :  { %122 = dma.vmem_to_hbm [thread:$0]  %s115_s1, 256, %s117_s23, [#allocation4], %s238_s17, %s238_s17, %s239_s18  }
  0x9f   :  { %235 = dma.done.wait [#allocation4], 256  }
  0xa0   :  { %236 = vsyncadd [#allocation4], 4294967040 }
  0xa1   :  { %127 = vsyncpa [#allocation3], 1 }
  0xa2   :  { %128 = vsyncpa [#allocation6], 1 }
  0xa3   :  { %129 = vsyncpa [#allocation4], 1 }

</bundles_post_ra>
